<compile_context>
chip_gen: v5e
topology: v5e:2x2
jax: 0.10.0
libtpu: 0.0.40
codegen_flags: <defaults>
</compile_context>

<pallas_src>
import functools

import jax
import jax.numpy as jnp
from jax.experimental import pallas as pl
from jax.experimental.pallas import tpu as pltpu


def _channel_attention_kernel(x_ref, w1t_ref, b1_ref, w2t_ref, b2_ref, o_ref,
                              *, inv_hw):
    # x_ref block: (TB, C, HWpad).  Padded lanes are zero, so the spatial sum
    # is exact; divide by the true HW via inv_hw.
    xv = x_ref[...]                                               # (TB, C, HWp)
    pooled = jnp.sum(xv.astype(jnp.float32), axis=-1) * inv_hw    # (TB, C) f32

    # SE-MLP as a batched matmul across the TB samples in this block.
    h = jnp.dot(pooled, w1t_ref[...], preferred_element_type=jnp.float32)
    h = jnp.maximum(h + b1_ref[...], 0.0)                         # (TB, hid)
    z = jnp.dot(h, w2t_ref[...], preferred_element_type=jnp.float32)
    z = jax.nn.sigmoid(z + b2_ref[...])                           # (TB, C)

    # Broadcast-multiply in the activation dtype (bf16-friendly on v6e/v7x).
    scale = z.astype(xv.dtype)[:, :, None]                        # (TB, C, 1)
    o_ref[...] = (xv * scale).astype(o_ref.dtype)


def _pick_batch_block(B, C, HWp, dtype_bytes, target_bytes):
    """Largest divisor of B whose (TB, C, HWp) block stays under target_bytes."""
    best = 1
    for tb in range(1, B + 1):
        if B % tb == 0 and tb * C * HWp * dtype_bytes <= target_bytes:
            best = tb
    return best


def channel_attention(x, w1, b1, w2, b2, *, target_block_bytes=2 << 20):
    """x: (B, C, H, W).  w1: (hid, C), b1: (hid,), w2: (C, hid), b2: (C,)."""
    B, C, H, W = x.shape
    hid = w1.shape[0]
    HW = H * W
    HWp = ((HW + 127) // 128) * 128            # lane-align the spatial axis

    x3 = x.reshape(B, C, HW)
    if HWp != HW:
        x3 = jnp.pad(x3, ((0, 0), (0, 0), (0, HWp - HW)))

    dtype_bytes = jnp.dtype(x.dtype).itemsize
    tb = _pick_batch_block(B, C, HWp, dtype_bytes, target_block_bytes)

    # Pre-transpose weights so the in-kernel MLP is (TB,C)@(C,hid)@(hid,C).
    w1t = jnp.asarray(w1).T.astype(jnp.float32)        # (C, hid)
    w2t = jnp.asarray(w2).T.astype(jnp.float32)        # (hid, C)
    b1r = jnp.asarray(b1).reshape(1, hid).astype(jnp.float32)
    b2r = jnp.asarray(b2).reshape(1, C).astype(jnp.float32)

    # Explicit VMEM budget: double-buffered input + output blocks + weights.
    block_bytes = tb * C * HWp * dtype_bytes
    weight_bytes = 4 * (w1t.size + w2t.size + b1r.size + b2r.size)
    vmem_limit = 4 * block_bytes + weight_bytes + (4 << 20)
    vmem_limit = int(max(16 << 20, min(vmem_limit, 48 << 20)))  # safe on v7x

    kernel = functools.partial(_channel_attention_kernel, inv_hw=1.0 / HW)

    out = pl.pallas_call(
        kernel,
        out_shape=jax.ShapeDtypeStruct((B, C, HWp), x.dtype),
        grid_spec=pltpu.PrefetchScalarGridSpec(
            num_scalar_prefetch=0,
            grid=(B // tb,),
            in_specs=[
                pl.BlockSpec((tb, C, HWp), lambda b: (b, 0, 0)),   # x
                pl.BlockSpec((C, hid), lambda b: (0, 0)),          # w1.T
                pl.BlockSpec((1, hid), lambda b: (0, 0)),          # b1
                pl.BlockSpec((hid, C), lambda b: (0, 0)),          # w2.T
                pl.BlockSpec((1, C), lambda b: (0, 0)),            # b2
            ],
            out_specs=pl.BlockSpec((tb, C, HWp), lambda b: (b, 0, 0)),
        ),
        compiler_params=pltpu.CompilerParams(
            dimension_semantics=("parallel",),
            vmem_limit_bytes=vmem_limit,
        ),
    )(x3, w1t, b1r, w2t, b2r)

    if HWp != HW:
        out = out[:, :, :HW]
    return out.reshape(B, C, H, W)


def _reference(x, w1, b1, w2, b2):
    y = jnp.mean(x.astype(jnp.float32), axis=(2, 3))       # (B, C)
    h = jnp.maximum(y @ w1.T + b1, 0.0)                    # (B, hid)
    z = jax.nn.sigmoid(h @ w2.T + b2)                      # (B, C)
    return (x * z[:, :, None, None].astype(x.dtype)).astype(x.dtype)


def _run_case(key, B, C, H, W, ratio):
    hid = max(C // ratio, 1)
    kx, kw1, kb1, kw2, kb2 = jax.random.split(key, 5)
    x = jax.random.normal(kx, (B, C, H, W), dtype=jnp.float32)
    w1 = jax.random.normal(kw1, (hid, C), dtype=jnp.float32) * 0.1
    b1 = jax.random.normal(kb1, (hid,), dtype=jnp.float32) * 0.1
    w2 = jax.random.normal(kw2, (C, hid), dtype=jnp.float32) * 0.1
    b2 = jax.random.normal(kb2, (C,), dtype=jnp.float32) * 0.1

    out = jax.block_until_ready(channel_attention(x, w1, b1, w2, b2))
    ref = _reference(x, w1, b1, w2, b2)
    assert out.shape == (B, C, H, W)
    assert jnp.allclose(out, ref, atol=1e-5, rtol=1e-5)


if __name__ == "__main__":
    key = jax.random.PRNGKey(0)
    k1, k2 = jax.random.split(key)
    # Lane-aligned spatial dims (H*W = 256).
    _run_case(k1, B=2, C=32, H=16, W=16, ratio=16)
    # Non-aligned spatial dims (H*W = 196 -> padded to 256) exercises padding.
    _run_case(k2, B=3, C=32, H=14, W=14, ratio=16)
    print("KERNEL_OK")
</pallas_src>

<mosaic_0001>
module attributes {stable_mosaic.version = 11 : i64} {
  func.func @_channel_attention_kernel(%arg0: i32, %arg1: memref<2x32x256xf32, #tpu.memory_space<vmem>>, %arg2: memref<32x2xf32, #tpu.memory_space<vmem>>, %arg3: memref<1x2xf32, #tpu.memory_space<vmem>>, %arg4: memref<2x32xf32, #tpu.memory_space<vmem>>, %arg5: memref<1x32xf32, #tpu.memory_space<vmem>>, %arg6: memref<2x32x256xf32, #tpu.memory_space<vmem>>) attributes {dimension_semantics = [#tpu.dimension_semantics<parallel>], iteration_bounds = array<i64: 1>, scalar_prefetch = 0 : i64, scratch_operands = 0 : i64, tpu.core_type = #tpu.core_type<tc>, window_params = [{transform_indices = @transform_0, window_bounds = array<i64: 2, 32, 256>}, {pipeline_mode = #tpu.pipeline_mode<synchronous>, transform_indices = @transform_1, window_bounds = array<i64: 32, 2>}, {pipeline_mode = #tpu.pipeline_mode<synchronous>, transform_indices = @transform_2, window_bounds = array<i64: 1, 2>}, {pipeline_mode = #tpu.pipeline_mode<synchronous>, transform_indices = @transform_3, window_bounds = array<i64: 2, 32>}, {pipeline_mode = #tpu.pipeline_mode<synchronous>, transform_indices = @transform_4, window_bounds = array<i64: 1, 32>}, {transform_indices = @transform_5, window_bounds = array<i64: 2, 32, 256>}]} {
    %c0 = arith.constant 0 : index
    %c0_0 = arith.constant 0 : index
    %c0_1 = arith.constant 0 : index
    %0 = vector.load %arg1[%c0, %c0_0, %c0_1] : memref<2x32x256xf32, #tpu.memory_space<vmem>>, vector<2x32x256xf32>
    %cst = arith.constant dense<0.000000e+00> : vector<2x32xf32>
    %1 = vector.multi_reduction <add>, %0, %cst [2] : vector<2x32x256xf32> to vector<2x32xf32>
    %cst_2 = arith.constant 3.906250e-03 : f32
    %2 = vector.broadcast %cst_2 : f32 to vector<2x32xf32>
    %3 = arith.mulf %1, %2 : vector<2x32xf32>
    %c0_3 = arith.constant 0 : index
    %c0_4 = arith.constant 0 : index
    %4 = vector.load %arg2[%c0_3, %c0_4] : memref<32x2xf32, #tpu.memory_space<vmem>>, vector<32x2xf32>
    %cst_5 = arith.constant dense<0.000000e+00> : vector<2x2xf32>
    %5 = tpu.matmul %3, %4, %cst_5 {dimension_numbers = #tpu.dot_dimension_numbers<[1], [0], [0], [1], [0, 0, 1, 1], [], []>} : vector<2x32xf32>, vector<32x2xf32>, vector<2x2xf32> -> vector<2x2xf32>
    %c0_6 = arith.constant 0 : index
    %c0_7 = arith.constant 0 : index
    %6 = vector.load %arg3[%c0_6, %c0_7] : memref<1x2xf32, #tpu.memory_space<vmem>>, vector<1x2xf32>
    %7 = vector.broadcast %6 : vector<1x2xf32> to vector<2x2xf32>
    %8 = arith.addf %5, %7 : vector<2x2xf32>
    %cst_8 = arith.constant 0.000000e+00 : f32
    %9 = vector.broadcast %cst_8 : f32 to vector<2x2xf32>
    %10 = arith.maximumf %8, %9 : vector<2x2xf32>
    %c0_9 = arith.constant 0 : index
    %c0_10 = arith.constant 0 : index
    %11 = vector.load %arg4[%c0_9, %c0_10] : memref<2x32xf32, #tpu.memory_space<vmem>>, vector<2x32xf32>
    %cst_11 = arith.constant dense<0.000000e+00> : vector<2x32xf32>
    %12 = tpu.matmul %10, %11, %cst_11 {dimension_numbers = #tpu.dot_dimension_numbers<[1], [0], [0], [1], [0, 0, 1, 1], [], []>} : vector<2x2xf32>, vector<2x32xf32>, vector<2x32xf32> -> vector<2x32xf32>
    %c0_12 = arith.constant 0 : index
    %c0_13 = arith.constant 0 : index
    %13 = vector.load %arg5[%c0_12, %c0_13] : memref<1x32xf32, #tpu.memory_space<vmem>>, vector<1x32xf32>
    %14 = vector.broadcast %13 : vector<1x32xf32> to vector<2x32xf32>
    %15 = arith.addf %12, %14 : vector<2x32xf32>
    %16 = arith.negf %15 : vector<2x32xf32>
    %17 = math.exp %16 : vector<2x32xf32>
    %cst_14 = arith.constant 1.000000e+00 : f32
    %18 = vector.broadcast %cst_14 : f32 to vector<2x32xf32>
    %19 = arith.addf %18, %17 : vector<2x32xf32>
    %20 = arith.divf %18, %19 : vector<2x32xf32>
    %21 = vector.shape_cast %20 : vector<2x32xf32> to vector<2x32x1xf32>
    %22 = vector.broadcast %21 : vector<2x32x1xf32> to vector<2x32x256xf32>
    %23 = arith.mulf %0, %22 : vector<2x32x256xf32>
    %c0_15 = arith.constant 0 : index
    %c0_16 = arith.constant 0 : index
    %c0_17 = arith.constant 0 : index
    %24 = vector.load %arg6[%c0_15, %c0_16, %c0_17] : memref<2x32x256xf32, #tpu.memory_space<vmem>>, vector<2x32x256xf32>
    tpu.vector_store %arg6[%c0_15, %c0_16, %c0_17], %23 {strides = array<i32>} : memref<2x32x256xf32, #tpu.memory_space<vmem>>, vector<2x32x256xf32>,
    return
  }
  func.func @transform_0(%arg0: i32) -> (i32, i32, i32) {
    %c0_i32 = arith.constant 0 : i32
    %c0_i32_0 = arith.constant 0 : i32
    %c0_i32_1 = arith.constant 0 : i32
    return %arg0, %c0_i32, %c0_i32_0 : i32, i32, i32
  }
  func.func @transform_1(%arg0: i32) -> (i32, i32) {
    %c0_i32 = arith.constant 0 : i32
    %c0_i32_0 = arith.constant 0 : i32
    %c0_i32_1 = arith.constant 0 : i32
    return %c0_i32, %c0_i32_0 : i32, i32
  }
  func.func @transform_2(%arg0: i32) -> (i32, i32) {
    %c0_i32 = arith.constant 0 : i32
    %c0_i32_0 = arith.constant 0 : i32
    %c0_i32_1 = arith.constant 0 : i32
    return %c0_i32, %c0_i32_0 : i32, i32
  }
  func.func @transform_3(%arg0: i32) -> (i32, i32) {
    %c0_i32 = arith.constant 0 : i32
    %c0_i32_0 = arith.constant 0 : i32
    %c0_i32_1 = arith.constant 0 : i32
    return %c0_i32, %c0_i32_0 : i32, i32
  }
  func.func @transform_4(%arg0: i32) -> (i32, i32) {
    %c0_i32 = arith.constant 0 : i32
    %c0_i32_0 = arith.constant 0 : i32
    %c0_i32_1 = arith.constant 0 : i32
    return %c0_i32, %c0_i32_0 : i32, i32
  }
  func.func @transform_5(%arg0: i32) -> (i32, i32, i32) {
    %c0_i32 = arith.constant 0 : i32
    %c0_i32_0 = arith.constant 0 : i32
    %c0_i32_1 = arith.constant 0 : i32
    return %arg0, %c0_i32, %c0_i32_0 : i32, i32, i32
  }
}

</mosaic_0001>

<bundles_post_ra>
// kernel: tpu_custom_call.1
= control target key start
LH: loop header
LB: loop body
LE: loop exit
PB: predicated region body
PF: predicated region fallthrough
CT: control target
= control target key end

     0   :  { %10 = vsyncpa [#allocation3], 0  ;;  %s508_s0 = inlined_call_operand.hbm [shape: f32[2,32,256], index: 0, kind: input, shape index: {}]   ;;  %s509_s1 = inlined_call_operand.vmem [shape: f32[32,2], index: 1, kind: input, shape index: {}]   ;;  %s510_s2 = inlined_call_operand.vmem [shape: f32[1,2], index: 2, kind: input, shape index: {}]   ;;  %s511_s3 = inlined_call_operand.vmem [shape: f32[2,32], index: 3, kind: input, shape index: {}]   ;;  %s512_s4 = inlined_call_operand.vmem [shape: f32[1,32], index: 4, kind: input, shape index: {}]   ;;  %s513_s5 = inlined_call_operand.hbm [shape: f32[2,32,256], index: 5, kind: output, shape index: {}]  }
   0x1   :  { %11 = vsyncpa [#allocation4], 0  ;;  %s16_s20 = sshll.u32 %s508_s0, 4  ;;  %s377_s21 = smov [#allocation2]   ;;  %s17_s20 = int_to_ptr.hbm [resolvable:$true] %s16_s20 }
   0x2   :  { %s18_s22 = sshll.u32 %s377_s21, 4  ;;  %s378_s23 = smov 256   ;;  %s19_s22 = int_to_ptr.vmem [resolvable:$true] %s18_s22 }
   0x3   :  { %s379_s24 = smov 16  }
   0x4   :  { %24 = dma.hbm_to_vmem [thread:$0]  %s17_s20, 2048, %s19_s22, [#allocation3], %s378_s23, %s378_s23, %s379_s24  }
   0x5   :  { %373 = dma.done.wait [#allocation3], 2048  }
   0x6   :  { %374 = vsyncadd [#allocation3], 4294965248  ;;  %v417_v0 = vld [vmem:[#allocation2 + $0x40] sm:$0xff]  ;;  %v419_v1 = vld [vmem:[#allocation2 + $0x48] sm:$0xff]  ;;  %v101_v31 = vlaneseq  ;;  %vm106_vm0 = vcmask 130112   ;;  %vm110_vm1 = vcmask 195712  }
   0x7   :  { %v421_v2 = vld [vmem:[#allocation2] sm:$0xff]  ;;  %v65_v3 = vadd.f32 %v419_v1, %v417_v0  ;;  %v425_v4 = vld [vmem:[#allocation2 + $0x8] sm:$0xff]  ;;  %v435_v9 = vld [vmem:[#allocation2 + $0x50] sm:$0xff]  ;;  %vm114_vm2 = vcmask 261312   ;;  %vm123_vm3 = vcmask 1041409   ;;  %vm125_vm4 = vcmask 261120  }
   0x8   :  { %v427_v5 = vld [vmem:[#allocation2 + $0x20] sm:$0xff]  ;;  %v429_v6 = vld [vmem:[#allocation2 + $0x28] sm:$0xff]  ;;  %v53_v7 = vadd.f32 %v425_v4, %v421_v2  ;;  %v437_v10 = vld [vmem:[#allocation2 + $0x58] sm:$0xff]  ;;  %v102_v32 = vand.u32 127, %v101_v31  ;;  %vm158_vm5 = vcmask 1041408   ;;  %vm154_vm6 = vcmask 15360  }
   0x9   :  { %v59_v8 = vadd.f32 %v429_v6, %v427_v5  ;;  %66 = vadd.xlane.f32.xlu1 %v65_v3  ;;  %v439_v11 = vld [vmem:[#allocation2 + $0x10] sm:$0xff]  ;;  %v441_v12 = vld [vmem:[#allocation2 + $0x18] sm:$0xff]  ;;  %v443_v13 = vld [vmem:[#allocation2 + $0x60] sm:$0xff]  ;;  %v68_v15 = vadd.f32 %v437_v10, %v435_v9  ;;  %s289_s13 = sshll.u32 %s513_s5, 4  ;;  %s290_s13 = int_to_ptr.hbm [resolvable:$true] %s289_s13 }
   0xa   :  { %54 = vadd.xlane.f32.xlu0 %v53_v7  ;;  %v445_v14 = vld [vmem:[#allocation2 + $0x68] sm:$0xff]  ;;  %v56_v16 = vadd.f32 %v441_v12, %v439_v11  ;;  %v453_v18 = vld [vmem:[#allocation2 + $0x70] sm:$0xff]  ;;  %v455_v19 = vld [vmem:[#allocation2 + $0x78] sm:$0xff]  ;;  %v104_v34 = vadd.s32 4294967288, %v102_v32  ;;  %v108_v43 = vadd.s32 4294967280, %v102_v32  ;;  %v112_v47 = vadd.s32 4294967272, %v102_v32 }
   0xb   :  { %60 = vadd.xlane.f32.xlu2 %v59_v8  ;;  %v71_v17 = vadd.f32 %v445_v14, %v443_v13  ;;  %v457_v20 = vld [vmem:[#allocation2 + $0x30] sm:$0xff]  ;;  %v459_v21 = vld [vmem:[#allocation2 + $0x38] sm:$0xff]  ;;  %v74_v22 = vadd.f32 %v455_v19, %v453_v18  ;;  %v86_v26 = vld [vmem:[%s509_s1 + $0x8] sm:$0xff] }
   0xc   :  { %v62_v23 = vadd.f32 %v459_v21, %v457_v20  ;;  %v88_v24 = vld [vmem:[%s509_s1 + $0x18] sm:$0xff]  ;;  %v87_v25 = vld [vmem:[%s509_s1 + $0x10] sm:$0xff]  ;;  %v85_v27 = vld [vmem:[%s509_s1] sm:$0xff] }
   0xd   :  { %140 = vmatpush.msra.mxu0 %v88_v24  ;;  %v149_v3 = vld [vmem:[%s511_s3] sm:$0x3] }
   0xe   :  { %303 = vmatpush.msk.msra.mxu1 %vm158_vm5, %v149_v3  ;;  %v319_v7 = vld [vmem:[%s510_s2] ss:$0 sm:$0xff]  ;;  %s380_s2 = smov [#allocation5]  }
   0xf   :  { %141 = vmatpush.msra.mxu0 %v87_v25  ;;  %v320_v24 = vld [vmem:[%s512_s4] ss:$0 sm:$0xff]  ;;  %s287_s3 = sshll.u32 %s380_s2, 4  ;;  %s288_s3 = int_to_ptr.vmem [resolvable:$true] %s287_s3 }
  0x11   :  { %69 = vadd.xlane.f32.xlu1 %v68_v15  ;;  %142 = vmatpush.msra.mxu0 %v86_v26 }
  0x12   :  { %57 = vadd.xlane.f32.xlu0 %v56_v16 }
  0x13   :  { %72 = vadd.xlane.f32.xlu2 %v71_v17  ;;  %143 = vmatpush.msra.mxu0 %v85_v27  ;;  %v203_v17 = vshrl.u32 %v101_v31, 7 }
  0x15   :  { %310 = vset.pattern.permute.xlu2 %v203_v17 }
  0x19   :  { %75 = vadd.xlane.f32.xlu1 %v74_v22  ;;  %v216_v22 = vadd.s32 16, %v203_v17 }
  0x1a   :  { %63 = vadd.xlane.f32.xlu0 %v62_v23  ;;  %v210_v23 = vadd.s32 8, %v203_v17 }
  0x1b   :  { %312 = vset.pattern.permute.xlu1 %v216_v22 }
  0x1c   :  { %311 = vset.pattern.permute.xlu0 %v210_v23 }
  0x7c   :  { %v67_v28 = vpop.xlane.xlu1 %66 }
  0x7d   :  { %v55_v29 = vpop.xlane.xlu0 %54  ;;  %v81_v39 = vmul.f32 0.00390625, %v67_v28 }
  0x7e   :  { %v61_v30 = vpop.xlane.xlu2 %60  ;;  %v77_v40 = vmul.f32 0.00390625, %v55_v29 }
  0x7f   :  { %v116_v45 = vperm.slane %v81_v39, %v102_v32  ;;  %v79_v46 = vmul.f32 0.00390625, %v61_v30 }
  0x80   :  { %v103_v48 = vperm.slane %v77_v40, %v102_v32 }
  0x81   :  { %v109_v56 = vperm.slane %v79_v46, %v108_v43 }
  0x84   :  { %v70_v33 = vpop.xlane.xlu1 %69 }
  0x85   :  { %v82_v35 = vmul.f32 0.00390625, %v70_v33  ;;  %v58_v36 = vpop.xlane.xlu0 %57 }
  0x86   :  { %v73_v37 = vpop.xlane.xlu2 %72  ;;  %v78_v38 = vmul.f32 0.00390625, %v58_v36 }
  0x87   :  { %v83_v41 = vmul.f32 0.00390625, %v73_v37  ;;  %v117_v42 = vperm.slane %v82_v35, %v104_v34 }
  0x88   :  { %v105_v44 = vperm.slane %v78_v38, %v104_v34 }
  0x89   :  { %v119_v49 = vperm.slane %v83_v41, %v108_v43  ;;  %v118_v51 = vsel %vm106_vm0, %v117_v42, %v116_v45  ;;  %v222_v41 = vadd.s32 24, %v203_v17 }
  0x8a   :  { %v107_v54 = vsel %vm106_vm0, %v105_v44, %v103_v48 }
  0x8b   :  { %v120_v59 = vsel %vm110_vm1, %v119_v49, %v118_v51  ;;  %v111_v60 = vsel %vm110_vm1, %v109_v56, %v107_v54 }
  0x8c   :  { %v76_v50 = vpop.xlane.xlu1 %75 }
  0x8d   :  { %v84_v52 = vmul.f32 0.00390625, %v76_v50  ;;  %v64_v53 = vpop.xlane.xlu0 %63 }
  0x8e   :  { %v80_v55 = vmul.f32 0.00390625, %v64_v53 }
  0x8f   :  { %v121_v57 = vperm.slane %v84_v52, %v112_v47 }
  0x90   :  { %v113_v58 = vperm.slane %v80_v55, %v112_v47 }
  0x91   :  { %v122_v61 = vsel %vm114_vm2, %v121_v57, %v120_v59 }
  0x92   :  { %v115_v62 = vsel %vm114_vm2, %v113_v58, %v111_v60 }
  0x93   :  { %v124_v63 = vsel %vm123_vm3, %v122_v61, %v115_v62 }
  0x94   :  { %302 = vmatmul.msk.f32.vlgmr.msra.gmra.mxu0 %vm125_vm4, %v124_v63 }
 0x111   :  { %v145_v8 = vpop.f32.mrf.mxu0 }
 0x112   :  { %v146_v15 = vadd.f32 %v319_v7, %v145_v8 }
 0x114   :  { %v148_v16 = vmax.f32 %v146_v15, 0.0 }
 0x116   :  { %304 = vmatmul.msk.f32.vlgmr.msra.gmra.mxu1 %vm154_vm6, %v148_v16 }
 0x193   :  { %v179_v25 = vpop.f32.mrf.mxu1 }
 0x194   :  { %v180_v26 = vadd.f32 %v320_v24, %v179_v25 }
 0x196   :  { %v305_v27 = vmul.f32 -1.442695, %v180_v26 }
 0x198   :  { %321 = vpow2.f32 %v305_v27 }
 0x19e   :  { %v322_v28 = vpop.eup %321 }
 0x19f   :  { %v185_v29 = vadd.f32 1.0, %v322_v28 }
 0x1a1   :  { %323 = vrcp.f32 %v185_v29  ;;  %v197_v31 = vand.u32 2147483648, %v185_v29  ;;  %v195_v35 = vand.u32 2147483647, %v185_v29  ;;  %vm191_vm8 = vweird.f32 %v185_v29 }
 0x1a3   :  { %v198_v37 = vor.u32 1.1754944e-38, %v197_v31  ;;  %vm196_vm10 = vcmp.eq.f32.partialorder %v195_v35, 8.507059e+37 }
 0x1a7   :  { %v324_v30 = vpop.eup %323 }
 0x1a8   :  { %v187_v32 = vmul.f32 %v324_v30, %v185_v29  ;;  %vm192_vm7 = vweird.f32 %v324_v30 }
 0x1a9   :  { %vm193_vm9 = vmor %vm191_vm8, %vm192_vm7 }
 0x1aa   :  { %v188_v33 = vsub.f32 1.0, %v187_v32 }
 0x1ac   :  { %v189_v34 = vmul.f32 %v324_v30, %v188_v33 }
 0x1ae   :  { %v190_v36 = vadd.f32 %v324_v30, %v189_v34 }
 0x1b0   :  { %v194_v38 = vsel %vm193_vm9, %v324_v30, %v190_v36 }
 0x1b1   :  { %v199_v39 = vsel %vm196_vm10, %v198_v37, %v194_v38 }
 0x1b2   :  { %v201_v40 = vperm.slane %v199_v39, 0  ;;  %v226_v42 = vperm.slane %v199_v39, 1 }
 0x1b4   :  { %218 = vperm.xlu1 %312, %v201_v40   ;;  %212 = vperm.xlu0 %311, %v201_v40  }
 0x1b5   :  { %206 = vperm.xlu2 %310, %v201_v40  }
 0x1bc   :  { %315 = vset.pattern.permute.xlu1 %v210_v23  ;;  %318 = vset.pattern.permute.xlu0 %v222_v41 }
 0x1bd   :  { %313 = vset.pattern.permute.xlu2 %v222_v41 }
 0x1c4   :  { %237 = vperm.xlu1 %315, %v226_v42  }
 0x1c5   :  { %224 = vperm.xlu2 %313, %v201_v40  }
 0x1cc   :  { %317 = vset.pattern.permute.xlu1 %v222_v41 }
 0x1cd   :  { %314 = vset.pattern.permute.xlu2 %v203_v17 }
 0x1d4   :  { %249 = vperm.xlu1 %317, %v226_v42  }
 0x1d5   :  { %231 = vperm.xlu2 %314, %v226_v42  }
 0x1dd   :  { %316 = vset.pattern.permute.xlu2 %v216_v22 }
 0x1e5   :  { %243 = vperm.xlu2 %316, %v226_v42  }
 0x20f   :  { %v207_v43 = vpop.permute.xlu2 %206 }
 0x210   :  { %v251_v44 = vmul.f32 %v207_v43, %v421_v2  ;;  %v252_v45 = vmul.f32 %v207_v43, %v425_v4 }
 0x212   :  { %267 = vst [vmem:[#allocation5] sm:$0xff] %v251_v44 }
 0x213   :  { %268 = vst [vmem:[#allocation5 + $0x8] sm:$0xff] %v252_v45 }
 0x21f   :  { %v225_v46 = vpop.permute.xlu2 %224 }
 0x220   :  { %v257_v47 = vmul.f32 %v225_v46, %v457_v20  ;;  %v258_v48 = vmul.f32 %v225_v46, %v459_v21 }
 0x222   :  { %273 = vst [vmem:[#allocation5 + $0x30] sm:$0xff] %v257_v47 }
 0x223   :  { %274 = vst [vmem:[#allocation5 + $0x38] sm:$0xff] %v258_v48 }
 0x226   :  { %v219_v49 = vpop.permute.xlu1 %218  ;;  %v213_v50 = vpop.permute.xlu0 %212 }
 0x227   :  { %v255_v51 = vmul.f32 %v219_v49, %v427_v5  ;;  %v256_v52 = vmul.f32 %v219_v49, %v429_v6  ;;  %v253_v53 = vmul.f32 %v213_v50, %v439_v11  ;;  %v254_v2 = vmul.f32 %v213_v50, %v441_v12 }
 0x229   :  { %271 = vst [vmem:[#allocation5 + $0x20] sm:$0xff] %v255_v51 }
 0x22a   :  { %272 = vst [vmem:[#allocation5 + $0x28] sm:$0xff] %v256_v52 }
 0x22b   :  { %269 = vst [vmem:[#allocation5 + $0x10] sm:$0xff] %v253_v53 }
 0x22c   :  { %270 = vst [vmem:[#allocation5 + $0x18] sm:$0xff] %v254_v2 }
 0x22f   :  { %v232_v4 = vpop.permute.xlu2 %231 }
 0x230   :  { %v259_v20 = vmul.f32 %v232_v4, %v417_v0  ;;  %v260_v21 = vmul.f32 %v232_v4, %v419_v1 }
 0x232   :  { %275 = vst [vmem:[#allocation5 + $0x40] sm:$0xff] %v259_v20 }
 0x233   :  { %276 = vst [vmem:[#allocation5 + $0x48] sm:$0xff] %v260_v21 }
 0x236   :  { %v238_v54 = vpop.permute.xlu1 %237 }
 0x237   :  { %v261_v5 = vmul.f32 %v238_v54, %v435_v9  ;;  %v262_v6 = vmul.f32 %v238_v54, %v437_v10 }
 0x239   :  { %277 = vst [vmem:[#allocation5 + $0x50] sm:$0xff] %v261_v5 }
 0x23a   :  { %278 = vst [vmem:[#allocation5 + $0x58] sm:$0xff] %v262_v6 }
 0x23f   :  { %v244_v11 = vpop.permute.xlu2 %243 }
 0x240   :  { %v263_v12 = vmul.f32 %v244_v11, %v443_v13  ;;  %v264_v55 = vmul.f32 %v244_v11, %v445_v14 }
 0x242   :  { %279 = vst [vmem:[#allocation5 + $0x60] sm:$0xff] %v263_v12 }
 0x243   :  { %280 = vst [vmem:[#allocation5 + $0x68] sm:$0xff] %v264_v55 }
 0x246   :  { %v250_v0 = vpop.permute.xlu1 %249 }
 0x247   :  { %v265_v1 = vmul.f32 %v250_v0, %v453_v18  ;;  %v266_v9 = vmul.f32 %v250_v0, %v455_v19 }
 0x249   :  { %281 = vst [vmem:[#allocation5 + $0x70] sm:$0xff] %v265_v1 }
 0x24a   :  { %282 = vst [vmem:[#allocation5 + $0x78] sm:$0xff] %v266_v9 }
 0x24b   :  { %295 = dma.vmem_to_hbm [thread:$0]  %s288_s3, 2048, %s290_s13, [#allocation4], %s378_s23, %s378_s23, %s379_s24  }
 0x24c   :  { %375 = dma.done.wait [#allocation4], 2048  }
 0x24d   :  { %376 = vsyncadd [#allocation4], 4294965248 }
 0x24e   :  { %300 = vsyncpa [#allocation3], 1 }
 0x24f   :  { %301 = vsyncpa [#allocation4], 1 }

</bundles_post_ra>
